<compile_context>
chip_gen: v6e
topology: v6e:2x2x1
jax: 0.10.0
libtpu: 0.0.40
codegen_flags: <defaults>
</compile_context>

<pallas_src>
from typing import NamedTuple, Optional

import jax
import jax.numpy as jnp
from jax.experimental import pallas as pl
from jax.experimental.pallas import tpu as pltpu

_SUBLANE = 16            # bf16 sublane packing -> 16-row-aligned token tiles
_LANE = 128
_MIN_SPLIT_TM = 256      # only split M into 2 tiles (v7x megacore) above this


def _round_up(x: int, m: int) -> int:
    return ((x + m - 1) // m) * m


def _cdiv(a: int, b: int) -> int:
    return -(-a // b)


def _round_hidden(dim: int, multiple_of: int, ffn_dim_multiplier=None) -> int:
    hidden = 4 * dim
    hidden = int(2 * hidden / 3)
    if ffn_dim_multiplier is not None:
        hidden = int(ffn_dim_multiplier * hidden)
    return multiple_of * ((hidden + multiple_of - 1) // multiple_of)


class FFNWeights(NamedTuple):
    # w13: (D, 2*Hpad), tile-interleaved: columns [h*2th, h*2th+th) are W1^T's
    #      h-th th-wide column tile; the next th columns are W3^T's h-th tile.
    w13: jax.Array
    # w2t: (Hpad, D)  (W2^T, hidden rows zero-padded to Hpad)
    w2t: jax.Array
    th: int


def prepare_ffn_weights(w1, w2, w3, *, th=512, compute_dtype=jnp.bfloat16):
    """One-time repack of PyTorch-layout weights into kernel layout.

    w1, w3: [H, D] (nn.Linear(dim, hidden).weight), w2: [D, H].
    Do this once at load time, NOT per forward call.
    th >= 256 (default 512) fills the 256-deep MXU K-dim on v6e/v7x for the
    down-projection; th is always rounded to a multiple of 128.
    """
    H, D = w1.shape
    th_eff = min(_round_up(th, _LANE), _round_up(H, _LANE))
    assert th_eff % _LANE == 0, "hidden tile must be lane (128) aligned"
    Hpad = _round_up(H, th_eff)
    nh = Hpad // th_eff

    w1t = jnp.zeros((D, Hpad), compute_dtype).at[:, :H].set(w1.T.astype(compute_dtype))
    w3t = jnp.zeros((D, Hpad), compute_dtype).at[:, :H].set(w3.T.astype(compute_dtype))
    w2t = jnp.zeros((Hpad, D), compute_dtype).at[:H, :].set(w2.T.astype(compute_dtype))

    # Interleave per th-wide tile so one (D, 2*th) block = [w1 tile h | w3 tile h].
    fused = jnp.concatenate(
        [w1t.reshape(D, nh, 1, th_eff), w3t.reshape(D, nh, 1, th_eff)], axis=2
    ).reshape(D, 2 * Hpad)
    return FFNWeights(w13=fused, w2t=w2t, th=th_eff)


def _vmem_budget_bytes() -> int:
    """Per-generation VMEM budget: ~100 MiB on 128 MiB chips (v5e/v6e),
    ~56 MiB on v7x (64 MiB physical, leave compiler scratch headroom)."""
    try:
        cap = int(pltpu.get_tpu_info().vmem_capacity_bytes)
    except Exception:
        cap = 64 * 1024 * 1024        # conservative (v7x-sized) fallback
    return max(32 * 1024 * 1024, min(cap - 8 * 1024 * 1024, 100 * 1024 * 1024))


def _default_tm(budget: int) -> int:
    # v5e/v6e (big VMEM): tm ~1024 clears v6e's ~650 FLOP/byte roofline.
    # v7x (64 MiB): ~310 FLOP/byte roofline, tighter VMEM -> tm=512.
    return 1024 if budget >= 80 * 1024 * 1024 else 512


def _choose_tm(M: int, tm: int) -> int:
    tm_eff = min(tm, _round_up(M, _SUBLANE))
    # v7x megacore: the 'parallel' M axis only uses both TensorCores when
    # there are >= 2 M-tiles.  Split (roughly evenly) when M is large enough.
    n = _cdiv(M, tm_eff)
    if n <= 2 and M >= 2 * _MIN_SPLIT_TM:
        tm_eff = min(tm_eff, _round_up(_cdiv(M, 2), _SUBLANE))
    return tm_eff


def _working_set_bytes(tm: int, th: int, D: int, x_bytes: int, out_bytes: int) -> int:
    return (2 * tm * D * x_bytes          # x tile (double-buffered, native dtype)
            + 2 * (D * 2 * th) * 2        # fused [W1|W3] tile, bf16
            + 2 * (th * D) * 2            # W2^T tile, bf16
            + 2 * tm * D * out_bytes      # output tile
            + tm * D * 4)                 # f32 accumulator scratch


def _ffn_kernel(x_ref, w13_ref, w2_ref, o_ref, acc_ref):
    # x_ref: (tm, D) native-dtype   w13_ref: (D, 2*th) bf16   w2_ref: (th, D) bf16
    # o_ref: (tm, D) out-dtype      acc_ref: (tm, D) f32 scratch
    h = pl.program_id(1)

    @pl.when(h == 0)
    def _():
        acc_ref[...] = jnp.zeros_like(acc_ref)

    # Cast x after load (keeps the wrapper free of extra HBM passes over x);
    # single fused gate+up matmul on the MXU with f32 accumulation.
    xt = x_ref[...].astype(w13_ref.dtype)
    h13 = jnp.dot(xt, w13_ref[...], preferred_element_type=jnp.float32)
    th = h13.shape[-1] // 2
    h1 = h13[:, :th]
    h3 = h13[:, th:]
    gated = (h1 * jax.nn.sigmoid(h1)) * h3          # SiLU * gate in f32 (VPU/EUP)

    # Down-projection tile, accumulated over the hidden (reduction) axis.
    acc_ref[...] += jnp.dot(gated.astype(w2_ref.dtype), w2_ref[...],
                            preferred_element_type=jnp.float32)

    @pl.when(h == pl.num_programs(1) - 1)
    def _():
        o_ref[...] = acc_ref[...].astype(o_ref.dtype)


def feed_forward(x, weights: FFNWeights, *, tm: Optional[int] = None,
                 out_dtype=None):
    """SwiGLU FFN.  x: [B, S, D] -> [B, S, D].

    Pass out_dtype=jnp.bfloat16 when the consumer accepts bf16: halves output
    writeback traffic and the double-buffered output tile's VMEM footprint.
    """
    B, S, D = x.shape
    M = B * S
    th = weights.th
    Hpad = weights.w2t.shape[0]
    nh = Hpad // th
    out_dtype = x.dtype if out_dtype is None else out_dtype

    x_bytes = jnp.dtype(x.dtype).itemsize
    o_bytes = jnp.dtype(out_dtype).itemsize

    budget = _vmem_budget_bytes()
    if tm is None:
        tm = _default_tm(budget)
    tm_eff = _choose_tm(M, tm)
    # Auto-shrink the token tile until the double-buffered working set fits.
    while (tm_eff > _SUBLANE
           and _working_set_bytes(tm_eff, th, D, x_bytes, o_bytes) > budget):
        tm_eff = max(_SUBLANE, _round_up(tm_eff // 2, _SUBLANE))
    # TODO(synk): at very large D (>=8K) on v7x the weight tiles alone
    # (~12*D*th bytes double-buffered) can exceed the 64 MiB budget; that case
    # needs an output-D tile axis on the down projection (D is untiled here).

    n_m = _cdiv(M, tm_eff)

    # No cast, no pad on x here: cast happens in-kernel, and a ragged last
    # M-tile (M not a multiple of tm_eff) is handled by the Pallas pipeline
    # (rows are independent, out-of-range writes are clipped).
    x2d = x.reshape(M, D)

    w13_bytes = weights.w13.size * jnp.dtype(weights.w13.dtype).itemsize
    w2_bytes = weights.w2t.size * jnp.dtype(weights.w2t.dtype).itemsize
    cost = pl.CostEstimate(
        flops=int(6 * M * D * Hpad),
        transcendentals=int(M * Hpad),
        bytes_accessed=int(M * D * x_bytes + M * D * o_bytes
                           + n_m * (w13_bytes + w2_bytes)),
    )

    out2d = pl.pallas_call(
        _ffn_kernel,
        out_shape=jax.ShapeDtypeStruct((M, D), out_dtype),
        grid_spec=pltpu.PrefetchScalarGridSpec(
            num_scalar_prefetch=0,
            grid=(n_m, nh),                                     # (token tiles, hidden tiles)
            in_specs=[
                pl.BlockSpec((tm_eff, D), lambda i, h: (i, 0)),  # x tile (resident over h)
                pl.BlockSpec((D, 2 * th), lambda i, h: (0, h)),  # fused [W1|W3] column tile
                pl.BlockSpec((th, D), lambda i, h: (h, 0)),      # W2^T row tile
            ],
            out_specs=pl.BlockSpec((tm_eff, D), lambda i, h: (i, 0)),
            scratch_shapes=[pltpu.VMEM((tm_eff, D), jnp.float32)],  # f32 accumulator
        ),
        compiler_params=pltpu.CompilerParams(
            dimension_semantics=("parallel", "arbitrary"),
            vmem_limit_bytes=int(budget),                       # per-generation, not hardcoded
        ),
        cost_estimate=cost,
    )(x2d, weights.w13, weights.w2t)

    return out2d.reshape(B, S, D)


def feed_forward_ref(x, w1, w2, w3):
    h1 = jnp.einsum("bsd,hd->bsh", x, w1)
    h3 = jnp.einsum("bsd,hd->bsh", x, w3)
    return jnp.einsum("bsh,dh->bsd", h1 * jax.nn.sigmoid(h1) * h3, w2)


if __name__ == "__main__":
    # ModelArgs-equivalent: dim=128, multiple_of=128, ffn_dim_multiplier=None
    dim = 128
    multiple_of = 128
    hidden = _round_hidden(dim, multiple_of)   # 4*128=512 -> 341 -> rounds to 384

    B, S = 2, 8
    key = jax.random.PRNGKey(0)
    kx, k1, k2, k3 = jax.random.split(key, 4)

    x = jax.random.normal(kx, (B, S, dim), dtype=jnp.float32)
    scale_in = 1.0 / jnp.sqrt(dim)
    scale_hid = 1.0 / jnp.sqrt(hidden)
    w1 = jax.random.normal(k1, (hidden, dim), dtype=jnp.float32) * scale_in
    w2 = jax.random.normal(k2, (dim, hidden), dtype=jnp.float32) * scale_hid
    w3 = jax.random.normal(k3, (hidden, dim), dtype=jnp.float32) * scale_in

    # One-time weight repack.  th=128 here only so the small demo exercises the
    # 3-step hidden reduction; production should keep the default th=512.
    weights = prepare_ffn_weights(w1, w2, w3, th=128, compute_dtype=jnp.bfloat16)

    out = feed_forward(x, weights)
    out = jax.block_until_ready(out)

    ref = feed_forward_ref(x, w1, w2, w3)
    assert out.shape == (B, S, dim)
    # bf16 MXU inputs with f32 accumulation -> looser tolerance than pure f32.
    assert jnp.allclose(out, ref, atol=5e-2, rtol=5e-2), "mismatch vs reference"

    print("KERNEL_OK")
</pallas_src>

<mosaic_0001>
module attributes {stable_mosaic.version = 11 : i64} {
  func.func @_ffn_kernel(%arg0: i32, %arg1: i32, %arg2: memref<16x128xf32, #tpu.memory_space<vmem>>, %arg3: memref<128x256xbf16, #tpu.memory_space<vmem>>, %arg4: memref<128x128xbf16, #tpu.memory_space<vmem>>, %arg5: memref<16x128xf32, #tpu.memory_space<vmem>>, %arg6: memref<16x128xf32, #tpu.memory_space<vmem>>) attributes {dimension_semantics = [#tpu.dimension_semantics<parallel>, #tpu.dimension_semantics<arbitrary>], iteration_bounds = array<i64: 1, 3>, scalar_prefetch = 0 : i64, scratch_operands = 1 : i64, tpu.core_type = #tpu.core_type<tc>, window_params = [{transform_indices = @transform_0, window_bounds = array<i64: 16, 128>}, {transform_indices = @transform_1, window_bounds = array<i64: 128, 256>}, {transform_indices = @transform_2, window_bounds = array<i64: 128, 128>}, {transform_indices = @transform_3, window_bounds = array<i64: 16, 128>}]} {
    %c0_i32 = arith.constant 0 : i32
    %0 = arith.cmpi eq, %arg1, %c0_i32 : i32
    %1 = arith.extui %0 : i1 to i32
    %c0_i32_0 = arith.constant 0 : i32
    %2 = arith.cmpi ne, %1, %c0_i32_0 : i32
    scf.if %2 {
      %cst_13 = arith.constant 0.000000e+00 : f32
      %25 = vector.broadcast %cst_13 : f32 to vector<16x128xf32>
      %c0_14 = arith.constant 0 : index
      %c0_15 = arith.constant 0 : index
      %26 = vector.load %arg6[%c0_14, %c0_15] : memref<16x128xf32, #tpu.memory_space<vmem>>, vector<16x128xf32>
      tpu.vector_store %arg6[%c0_14, %c0_15], %25 {strides = array<i32>} : memref<16x128xf32, #tpu.memory_space<vmem>>, vector<16x128xf32>,
    } else {
    }
    %c0 = arith.constant 0 : index
    %c0_1 = arith.constant 0 : index
    %3 = vector.load %arg2[%c0, %c0_1] : memref<16x128xf32, #tpu.memory_space<vmem>>, vector<16x128xf32>
    %4 = arith.truncf %3 : vector<16x128xf32> to vector<16x128xbf16>
    %c0_2 = arith.constant 0 : index
    %c0_3 = arith.constant 0 : index
    %5 = vector.load %arg3[%c0_2, %c0_3] : memref<128x256xbf16, #tpu.memory_space<vmem>>, vector<128x256xbf16>
    %cst = arith.constant dense<0.000000e+00> : vector<16x256xf32>
    %6 = tpu.matmul %4, %5, %cst {dimension_numbers = #tpu.dot_dimension_numbers<[1], [0], [0], [1], [0, 0, 1, 1], [], []>} : vector<16x128xbf16>, vector<128x256xbf16>, vector<16x256xf32> -> vector<16x256xf32>
    %7 = vector.extract_strided_slice %6 {offsets = [0, 0], sizes = [16, 128], strides = [1, 1]} : vector<16x256xf32> to vector<16x128xf32>
    %8 = vector.extract_strided_slice %6 {offsets = [0, 128], sizes = [16, 128], strides = [1, 1]} : vector<16x256xf32> to vector<16x128xf32>
    %9 = arith.negf %7 : vector<16x128xf32>
    %10 = math.exp %9 : vector<16x128xf32>
    %cst_4 = arith.constant 1.000000e+00 : f32
    %11 = vector.broadcast %cst_4 : f32 to vector<16x128xf32>
    %12 = arith.addf %11, %10 : vector<16x128xf32>
    %13 = arith.divf %11, %12 : vector<16x128xf32>
    %14 = arith.mulf %7, %13 : vector<16x128xf32>
    %15 = arith.mulf %14, %8 : vector<16x128xf32>
    %c0_5 = arith.constant 0 : index
    %c0_6 = arith.constant 0 : index
    %16 = vector.load %arg6[%c0_5, %c0_6] : memref<16x128xf32, #tpu.memory_space<vmem>>, vector<16x128xf32>
    %17 = arith.truncf %15 : vector<16x128xf32> to vector<16x128xbf16>
    %c0_7 = arith.constant 0 : index
    %c0_8 = arith.constant 0 : index
    %18 = vector.load %arg4[%c0_7, %c0_8] : memref<128x128xbf16, #tpu.memory_space<vmem>>, vector<128x128xbf16>
    %cst_9 = arith.constant dense<0.000000e+00> : vector<16x128xf32>
    %19 = tpu.matmul %17, %18, %cst_9 {dimension_numbers = #tpu.dot_dimension_numbers<[1], [0], [0], [1], [0, 0, 1, 1], [], []>} : vector<16x128xbf16>, vector<128x128xbf16>, vector<16x128xf32> -> vector<16x128xf32>
    %20 = arith.addf %16, %19 : vector<16x128xf32>
    %c0_10 = arith.constant 0 : index
    %c0_11 = arith.constant 0 : index
    %21 = vector.load %arg6[%c0_10, %c0_11] : memref<16x128xf32, #tpu.memory_space<vmem>>, vector<16x128xf32>
    tpu.vector_store %arg6[%c0_10, %c0_11], %20 {strides = array<i32>} : memref<16x128xf32, #tpu.memory_space<vmem>>, vector<16x128xf32>,
    %c2_i32 = arith.constant 2 : i32
    %22 = arith.cmpi eq, %arg1, %c2_i32 : i32
    %23 = arith.extui %22 : i1 to i32
    %c0_i32_12 = arith.constant 0 : i32
    %24 = arith.cmpi ne, %23, %c0_i32_12 : i32
    scf.if %24 {
      %c0_13 = arith.constant 0 : index
      %c0_14 = arith.constant 0 : index
      %25 = vector.load %arg6[%c0_13, %c0_14] : memref<16x128xf32, #tpu.memory_space<vmem>>, vector<16x128xf32>
      %c0_15 = arith.constant 0 : index
      %c0_16 = arith.constant 0 : index
      %26 = vector.load %arg5[%c0_15, %c0_16] : memref<16x128xf32, #tpu.memory_space<vmem>>, vector<16x128xf32>
      tpu.vector_store %arg5[%c0_15, %c0_16], %25 {strides = array<i32>} : memref<16x128xf32, #tpu.memory_space<vmem>>, vector<16x128xf32>,
    } else {
    }
    return
  }
  func.func @transform_0(%arg0: i32, %arg1: i32) -> (i32, i32) {
    %c0_i32 = arith.constant 0 : i32
    %c0_i32_0 = arith.constant 0 : i32
    return %arg0, %c0_i32 : i32, i32
  }
  func.func @transform_1(%arg0: i32, %arg1: i32) -> (i32, i32) {
    %c0_i32 = arith.constant 0 : i32
    %c0_i32_0 = arith.constant 0 : i32
    return %c0_i32, %arg1 : i32, i32
  }
  func.func @transform_2(%arg0: i32, %arg1: i32) -> (i32, i32) {
    %c0_i32 = arith.constant 0 : i32
    %c0_i32_0 = arith.constant 0 : i32
    return %arg1, %c0_i32 : i32, i32
  }
  func.func @transform_3(%arg0: i32, %arg1: i32) -> (i32, i32) {
    %c0_i32 = arith.constant 0 : i32
    %c0_i32_0 = arith.constant 0 : i32
    return %arg0, %c0_i32 : i32, i32
  }
}

</mosaic_0001>

<bundles_post_ra>
// kernel: tpu_custom_call.1
= control target key start
LH: loop header
LB: loop body
LE: loop exit
PB: predicated region body
PF: predicated region fallthrough
CT: control target
= control target key end

     0   :  { %8 = vsyncpa [#allocation4], 0  ;;  %s1251_s0 = inlined_call_operand.hbm [shape: f32[16,128], index: 0, kind: input, shape index: {}]   ;;  %s1252_s1 = inlined_call_operand.hbm [shape: bf16[128,768], index: 1, kind: input, shape index: {}]   ;;  %s1253_s2 = inlined_call_operand.hbm [shape: bf16[384,128], index: 2, kind: input, shape index: {}]   ;;  %s1254_s3 = inlined_call_operand.hbm [shape: f32[16,128], index: 3, kind: output, shape index: {}]  }
   0x1   :  { %9 = vsyncpa [#allocation7], 0 }
   0x2   :  { %11 = vsyncpa [#allocation7 + $0x1], 0 }
   0x3   :  { %12 = vsyncpa [#allocation5], 0  ;;  %s1057_s12 = smov 0   ;;  %s1059_s13 = smov 0  }
   0x4   :  { %s1061_s14 = smov 0   ;;  %s1063_s15 = smov 0  }
   0x5   :  { %s1065_s16 = smov 0   ;;  %s1067_s17 = smov 0  }
   0x6 LB: > { %s27_s18 = sadd.s32 1, %s1016_s16  ;;  %s63_s19 = sadd.s32 1, %s1008_s14  ;;  %s1020_s17 = sphi %s1067_s17, %s18_s17   ;;  %s1016_s16 = sphi %s1065_s16, %s1265_s16   ;;  %s1012_s15 = sphi %s1063_s15, %s1264_s15   ;;  %s1008_s14 = sphi %s1061_s14, %s1263_s14   ;;  %s1004_s13 = sphi %s1059_s13, %s1262_s13   ;;  %s1000_s12 = sphi %s1057_s12, %s1261_s12  }
   0x7   : > { %p28_p0 = scmp.ge.s32.totalorder %s27_s18, 3  ;;  %p70_p1 = scmp.ne.s32.totalorder %s1008_s14, %s1004_s13 }
   0x8   : > { %p71_p2 = scmp.eq.s32.totalorder %s1020_s17, 0  ;;  %p751_p5 = scmp.lt.s32.totalorder %s1020_s17, 3 }
   0x9   : > { %s1267_s18 = smov (%p28_p0, %s27_s18), 0  ;;  %s168_s22 = sand.u32 1, %s1020_s17  }
   0xa   : > { %p1094_p3 = por %p71_p2, %p70_p1  ;;  %s60_s21 = ssub.s32 %s1016_s16, %s1267_s18 }
   0xb   : > { %p61_p4 = scmp.eq.s32.totalorder %s60_s21, 0  ;;  %s170_s23 = sand.u32 1, %s1008_s14  }
   0xc   : > { %s654_s25 = sshll.u32 %s170_s23, 7  ;;  %s696_s26 = sshll.u32 %s1016_s16, 7 }
   0xd   : > { %s1104_s24 = scalar_select %p61_p4, %s1008_s14, %s63_s19  }
   0xe   : > { %s178_s29 = scalar_lea.hbm %s1252_s1, %s696_s26  ;;  %s172_s30 = scalar_lea.vmem [#allocation6], %s654_s25 }
   0xf   : > { %s179_s4 = sshll.u32 %s172_s30, 4  ;;  %p1114_p6 = pnand %p751_p5, %p1094_p3  ;;  %s180_s4 = int_to_ptr.vmem [resolvable:$true] %s179_s4 }
  0x10   : > { %s1118_s6 = scalar_lea.sflag [#allocation7], %s168_s22  ;;  %s869_s7 = scalar_lea.vmem %s180_s4, 2048 }
  0x11   : > { %p1255_p7 = pneg %p1114_p6  ;;  %p870_p8 = scmp.ne.s32.totalorder %s180_s4, %s869_s7 }
  0x12   : > { %s1022_s8 = smov [#allocation6]  }
  0x13   : > { %p872_p9 = pnand %p870_p8, %p1255_p7  ;;  %s874_s9 = sshll.u32 %s1022_s8, 4  ;;  %s875_s9 = int_to_ptr.vmem [resolvable:$false] %s874_s9 }
  0x14   : > { %s876_s10 = scalar_lea.vmem %s875_s9, 4096  ;;  %p877_p11 = scmp.lt.s32.totalorder %s180_s4, %s875_s9 }
  0x15   : > { %p873_p10 = pneg %p872_p9  ;;  %p878_p12 = scmp.lt.s32.totalorder %s876_s10, %s869_s7 }
  0x17   : > { %p879_p13 = por %p878_p12, %p877_p11 }
  0x19   : > { %p880_p0 = pnand %p879_p13, %p873_p10 }
  0x1b   : > { %883 = shalt.err (!%p880_p0)
}
  0x1c   : > { %s1023_s11 = smov 384   ;;  %s1024_s19 = smov 128  }
  0x1d   : > { %s1025_s20 = smov 8   ;;  %s1131_s21 = sadd.s32 4294967295, %s1020_s17  }
  0x1e   : > { %746 = dma.hbm_to_vmem [thread:$0]  (!%p1114_p6), %s178_s29, 2048, %s180_s4, %s1118_s6, %s1023_s11, %s1024_s19, %s1025_s20  }
  0x1f   : > { %p76_p1 = scmp.ne.s32.totalorder %s1004_s13, %s1000_s12  ;;  %p77_p2 = scmp.eq.s32.totalorder %s1131_s21, 0 }
  0x20   : > { %p651_p3 = scmp.ge.s32.totalorder %s1020_s17, 1  ;;  %p139_p4 = scmp.lt.s32.totalorder %s1020_s17, 4 }
  0x21   : > { %p1140_p5 = por %p77_p2, %p76_p1  ;;  %s1026_s26 = smov [#allocation3]  }
  0x22   : > { %p1144_p8 = pnand %p651_p3, %p139_p4  ;;  %s154_s27 = sshll.u32 %s1026_s26, 4  ;;  %s155_s27 = int_to_ptr.vmem [resolvable:$true] %s154_s27 }
  0x23   : > { %s657_s28 = sshll.u32 %s170_s23, 6  ;;  %s697_s12 = sshll.u32 %s1016_s16, 10 }
  0x24   : > { %p739_p9 = pneg %p1144_p8  ;;  %s193_s29 = scalar_lea.vmem [#allocation8], %s657_s28 }
  0x25   : > { %s200_s30 = sshll.u32 %s193_s29, 4  ;;  %s1158_s8 = scalar_lea.hbm %s1253_s2, %s697_s12  ;;  %s1160_s30 = int_to_ptr.vmem [resolvable:$true] %s200_s30 }
  0x26   : > { %p740_p10 = pnand %p739_p9, %p77_p2  ;;  %s895_s9 = scalar_lea.vmem %s155_s27, 256 }
  0x27   : > { %p896_p12 = scmp.ne.s32.totalorder %s155_s27, %s895_s9  ;;  %p903_p1 = scmp.lt.s32.totalorder %s155_s27, %s155_s27 }
  0x28   : > { %p886_p11 = pneg %p740_p10  ;;  %p904_p3 = scmp.lt.s32.totalorder %s895_s9, %s895_s9 }
  0x2a   : > { %p898_p13 = pnand %p896_p12, %p886_p11  ;;  %p905_p4 = por %p904_p3, %p903_p1 }
  0x2c   : > { %p899_p0 = pneg %p898_p13 }
  0x2e   : > { %p906_p7 = pnand %p905_p4, %p899_p0 }
  0x30   : > { %909 = shalt.err (!%p906_p7)
}
  0x31   : > { %742 = dma.hbm_to_vmem [thread:$0]  (!%p740_p10), %s1251_s0, 256, %s155_s27, [#allocation4], %s1024_s19, %s1024_s19, %s1025_s20  }
  0x32   : > { %s923_s11 = scalar_lea.vmem %s1160_s30, 1024  ;;  %p1260_p11 = pneg %p1114_p6 }
  0x33   : > { %p924_p9 = scmp.ne.s32.totalorder %s1160_s30, %s923_s11  ;;  %s1027_s26 = smov [#allocation8]  }
  0x34   : > { %s928_s28 = sshll.u32 %s1027_s26, 4  ;;  %s929_s28 = int_to_ptr.vmem [resolvable:$false] %s928_s28 }
  0x35   : > { %p926_p12 = pnand %p924_p9, %p1260_p11  ;;  %s930_s12 = scalar_lea.vmem %s929_s28, 2048 }
  0x36   : > { %p931_p7 = scmp.lt.s32.totalorder %s1160_s30, %s929_s28  ;;  %p932_p0 = scmp.lt.s32.totalorder %s930_s12, %s923_s11 }
  0x37   : > { %p927_p13 = pneg %p926_p12 }
  0x38   : > { %p933_p1 = por %p932_p0, %p931_p7 }
  0x3a   : > { %p934_p3 = pnand %p933_p1, %p927_p13 }
  0x3c   : > { %937 = shalt.err (!%p934_p3)
}
  0x3d   : > { %s1028_s29 = smov 64   ;;  %s1029_s19 = smov 4  }
  0x3e   : > { %749 = dma.hbm_to_vmem [thread:$0]  (!%p1114_p6), %s1158_s8, 1024, %s1160_s30, %s1118_s6, %s1028_s29, %s1028_s29, %s1029_s19  }
  0x3f   : > { %212 = sbr.rel (%p1144_p8) target bundleno = 574 (0x23e), region = 32 }
  0x44   : > { %987 = dma.done.wait (%p77_p2), [#allocation4], 256  }
  0x45   : > { %989 = vsyncadd (%p77_p2), [#allocation4], 4294967040  ;;  %s218_s20 = sand.u32 1, %s1131_s21   ;;  %s220_s27 = sand.u32 1, %s1004_s13  }
  0x46   : > { %s662_s4 = sshll.u32 %s220_s27, 7  ;;  %s219_s7 = scalar_lea.sflag [#allocation7], %s218_s20 }
  0x47   : > { %s1187_s9 = scalar_lea.vmem [#allocation6], %s662_s4 }
  0x48   : > { %991 = dma.done.wait (%p1140_p5), %s219_s7, 3072  }
  0x49   : > { %993 = vsyncadd (%p1140_p5), %s219_s7, 4294964224  ;;  %s663_s5 = sshll.u32 %s220_s27, 6  ;;  %p664_p6 = scmp.ne.s32.totalorder %s1012_s15, 0 }
  0x4a   : > { %s1193_s6 = scalar_lea.vmem [#allocation8], %s663_s5 }
  0x4b   : > { %262 = sbr.rel (%p664_p6) target bundleno = 82 (0x52), region = 48 }
  0x50   : > { %v1030_v0 = vmov 0.0  }
  0x51   : > { %263 = vst [vmem:[#allocation2] sm:$0xff] %v1030_v0  ;;  %264 = vst [vmem:[#allocation2 + $0x8] sm:$0xff] %v1030_v0 }
  0x52 PF: > { %v816_v1 = vld [vmem:[%s1187_s9 + $0x74] ss:$8 sps:$4 sm:$0xff]   ;;  %v818_v2 = vld [vmem:[%s1187_s9 + $0x70] ss:$8 sps:$4 sm:$0xff]   ;;  %v1031_v3 = vmov 0   ;;  %v1032_v22 = vmov 0.0  }
  0x53   : > { %396 = vmatprep.mubr.bf16.mxu0 %v1031_v3  ;;  %364 = vmatprep.subr.bf16.mxu0 %v816_v1  ;;  %v819_v4 = vld [vmem:[%s1187_s9 + $0x64] ss:$8 sps:$4 sm:$0xff]   ;;  %v821_v5 = vld [vmem:[%s1187_s9 + $0x60] ss:$8 sps:$4 sm:$0xff]   ;;  %v822_v6 = vld [vmem:[%s1187_s9 + $0x54] ss:$8 sps:$4 sm:$0xff]  }
  0x54   : > { %365 = vmatpush1.bf16.msra.mxu0 %v818_v2  ;;  %v824_v7 = vld [vmem:[%s1187_s9 + $0x50] ss:$8 sps:$4 sm:$0xff]   ;;  %v825_v8 = vld [vmem:[%s1187_s9 + $0x44] ss:$8 sps:$4 sm:$0xff]   ;;  %v827_v9 = vld [vmem:[%s1187_s9 + $0x40] ss:$8 sps:$4 sm:$0xff]   ;;  %707 = vmatprep.subr.bf16.mxu1 %v1032_v22 }
  0x55   : > { %366 = vmatprep.subr.bf16.mxu0 %v819_v4  ;;  %v828_v10 = vld [vmem:[%s1187_s9 + $0x34] ss:$8 sps:$4 sm:$0xff]   ;;  %v830_v11 = vld [vmem:[%s1187_s9 + $0x30] ss:$8 sps:$4 sm:$0xff]   ;;  %v831_v12 = vld [vmem:[%s1187_s9 + $0x24] ss:$8 sps:$4 sm:$0xff]  }
  0x56   : > { %v833_v13 = vld [vmem:[%s1187_s9 + $0x20] ss:$8 sps:$4 sm:$0xff]   ;;  %v834_v14 = vld [vmem:[%s1187_s9 + $0x14] ss:$8 sps:$4 sm:$0xff]   ;;  %v836_v15 = vld [vmem:[%s1187_s9 + $0x10] ss:$8 sps:$4 sm:$0xff]  }
  0x57   : > { %v837_v16 = vld [vmem:[%s1187_s9 + $0x4] ss:$8 sps:$4 sm:$0xff]   ;;  %v839_v17 = vld [vmem:[%s1187_s9] ss:$8 sps:$4 sm:$0xff]   ;;  %v265_v18 = vld [vmem:[#allocation3] sm:$0xff]  ;;  %vm1033_vm0 = vmmov 0  }
  0x58   : > { %367 = vmatpush1.bf16.msra.mxu0 %v821_v5  ;;  %v266_v19 = vld [vmem:[#allocation3 + $0x8] sm:$0xff]  ;;  %v841_v23 = vld [vmem:[%s1193_s6 + $0x30] sm:$0xff]   ;;  %v842_v24 = vld [vmem:[%s1193_s6 + $0x28] sm:$0xff]   ;;  %723 = vmatprep.mubr.msk.bf16.mxu1 %vm1033_vm0, %v1032_v22  ;;  %p691_p2 = scmp.ne.s32.totalorder %s1012_s15, 2 }
  0x59   : > { %368 = vmatprep.subr.bf16.mxu0 %v822_v6  ;;  %v267_v20 = vpack.c.bf16 %v266_v19, %v265_v18  ;;  %v840_v21 = vld [vmem:[%s1193_s6 + $0x38] sm:$0xff]   ;;  %v843_v25 = vld [vmem:[%s1193_s6 + $0x20] sm:$0xff]   ;;  %v845_v27 = vld [vmem:[%s1193_s6 + $0x10] sm:$0xff]  }
  0x5a   : > { %708 = vmatpush3.bf16.msra.mxu1 %v840_v21  ;;  %v844_v26 = vld [vmem:[%s1193_s6 + $0x18] sm:$0xff]   ;;  %v846_v28 = vld [vmem:[%s1193_s6 + $0x8] sm:$0xff]   ;;  %v847_v29 = vld [vmem:[%s1193_s6] sm:$0xff]  }
  0x5b   : > { %709 = vmatprep.subr.bf16.mxu1 %v1032_v22  ;;  %v423_v47 = vld [vmem:[#allocation2] sm:$0xff]  ;;  %v424_v51 = vld [vmem:[#allocation2 + $0x8] sm:$0xff] }
  0x5c   : > { %369 = vmatpush1.bf16.msra.mxu0 %v824_v7 }
  0x5d   : > { %370 = vmatprep.subr.bf16.mxu0 %v825_v8 }
  0x5e   : > { %710 = vmatpush3.bf16.msra.mxu1 %v841_v23 }
  0x5f   : > { %711 = vmatprep.subr.bf16.mxu1 %v1032_v22 }
  0x60   : > { %371 = vmatpush1.bf16.msra.mxu0 %v827_v9 }
  0x61   : > { %372 = vmatprep.subr.bf16.mxu0 %v828_v10 }
  0x62   : > { %712 = vmatpush3.bf16.msra.mxu1 %v842_v24 }
  0x63   : > { %713 = vmatprep.subr.bf16.mxu1 %v1032_v22 }
  0x64   : > { %373 = vmatpush1.bf16.msra.mxu0 %v830_v11 }
  0x65   : > { %374 = vmatprep.subr.bf16.mxu0 %v831_v12 }
  0x66   : > { %714 = vmatpush3.bf16.msra.mxu1 %v843_v25 }
  0x67   : > { %715 = vmatprep.subr.bf16.mxu1 %v1032_v22 }
  0x68   : > { %375 = vmatpush1.bf16.msra.mxu0 %v833_v13 }
  0x69   : > { %376 = vmatprep.subr.bf16.mxu0 %v834_v14 }
  0x6a   : > { %716 = vmatpush3.bf16.msra.mxu1 %v844_v26 }
  0x6b   : > { %717 = vmatprep.subr.bf16.mxu1 %v1032_v22 }
  0x6c   : > { %377 = vmatpush1.bf16.msra.mxu0 %v836_v15 }
  0x6d   : > { %378 = vmatprep.subr.bf16.mxu0 %v837_v16 }
  0x6e   : > { %718 = vmatpush3.bf16.msra.mxu1 %v845_v27 }
  0x6f   : > { %719 = vmatprep.subr.bf16.mxu1 %v1032_v22 }
  0x70   : > { %379 = vmatpush1.bf16.msra.mxu0 %v839_v17 }
  0x72   : > { %720 = vmatpush3.bf16.msra.mxu1 %v846_v28 }
  0x73   : > { %397 = vmatmul.mubr.bf16.vlgmr.msra.gmra.mxu0 %v267_v20  ;;  %721 = vmatprep.subr.bf16.mxu1 %v1032_v22 }
  0x76   : > { %722 = vmatpush3.bf16.msra.mxu1 %v847_v29 }
 0x133   : > { %v398_v30 = vpop.f32.mrf.mxu0 }
 0x134   : > { %v681_v31 = vmul.f32 -1.442695, %v398_v30 }
 0x135   : > { %v400_v32 = vpop.f32.mrf.mxu0 }
 0x136   : > { %848 = vpow2.f32 %v681_v31 }
 0x137   : > { %v402_v33 = vpop.f32.mrf.mxu0 }
 0x138   : > { %v682_v34 = vmul.f32 -1.442695, %v402_v33 }
 0x139   : > { %v404_v43 = vpop.f32.mrf.mxu0 }
 0x13a   : > { %850 = vpow2.f32 %v682_v34 }
 0x143   : > { %v849_v35 = vpop.eup %848 }
 0x144   : > { %v413_v36 = vadd.f32 1.0, %v849_v35 }
 0x146   : > { %852 = vrcp.f32 %v413_v36 }
 0x147   : > { %v851_v37 = vpop.eup %850 }
 0x148   : > { %v414_v38 = vadd.f32 1.0, %v851_v37 }
 0x14a   : > { %854 = vrcp.f32 %v414_v38 }
 0x153   : > { %v853_v39 = vpop.eup %852 }
 0x154   : > { %v419_v40 = vmul.f32 %v853_v39, %v398_v30 }
 0x156   : > { %v421_v44 = vmul.f32 %v419_v40, %v400_v32 }
 0x157   : > { %v855_v41 = vpop.eup %854 }
 0x158   : > { %v420_v42 = vmul.f32 %v855_v41, %v402_v33 }
 0x15a   : > { %v422_v45 = vmul.f32 %v420_v42, %v404_v43 }
 0x15c   : > { %v425_v46 = vpack.c.bf16 %v422_v45, %v421_v44 }
 0x15e   : > { %724 = vmatmul.mubr.bf16.vlgmr.msra.gmra.mxu1 %v425_v46 }
 0x21e   : > { %v524_v48 = vpop.f32.mrf.mxu1 }
 0x21f   : > { %v531_v49 = vadd.f32 %v524_v48, %v423_v47 }
 0x220   : > { %v725_v50 = vpop.f32.mrf.mxu1 }
 0x221   : > { %533 = vst [vmem:[#allocation2] sm:$0xff] %v531_v49  ;;  %538 = sbr.rel (%p691_p2) target bundleno = 558 (0x22e), region = 52 }
 0x222   : > { %v527_v52 = vpop.f32.mrf.mxu1 }
 0x223   : > { %v532_v53 = vadd.f32 %v527_v52, %v424_v51 }
 0x224   : > { %v726_v54 = vpop.f32.mrf.mxu1 }
 0x225   : > { %534 = vst [vmem:[#allocation2 + $0x8] sm:$0xff] %v532_v53 }
 0x228   : > { %v539_v55 = vld [vmem:[#allocation2] sm:$0xff] }
 0x229   : > { %541 = vst [vmem:[#allocation9] sm:$0xff] %v539_v55 }
 0x22c   : > { %v540_v56 = vld [vmem:[#allocation2 + $0x8] sm:$0xff] }
 0x22d   : > { %542 = vst [vmem:[#allocation9 + $0x8] sm:$0xff] %v540_v56 }
 0x22e PF: > { %p753_p5 = scmp.eq.s32.totalorder %s1131_s21, 2  ;;  %s1034_s22 = smov [#allocation9]  }
 0x22f   : > { %s552_s25 = sshll.u32 %s1034_s22, 4  ;;  %s553_s25 = int_to_ptr.vmem [resolvable:$true] %s552_s25 }
 0x230   : > { %s938_s30 = scalar_lea.vmem %s553_s25, 256  ;;  %p945_p9 = scmp.lt.s32.totalorder %s553_s25, %s553_s25 }
 0x231   : > { %p939_p8 = scmp.ne.s32.totalorder %s553_s25, %s938_s30  ;;  %p946_p11 = scmp.lt.s32.totalorder %s938_s30, %s938_s30 }
 0x233   : > { %p940_p10 = pnand %p939_p8, %p753_p5  ;;  %p947_p12 = por %p946_p11, %p945_p9 }
 0x235   : > { %p941_p4 = pneg %p940_p10 }
 0x237   : > { %p948_p13 = pnand %p947_p12, %p941_p4 }
 0x239   : > { %951 = shalt.err (!%p948_p13)
}
 0x23a   : > { %s1035_s15 = smov 128   ;;  %s1036_s8 = smov 8  }
 0x23b   : > { %736 = dma.vmem_to_hbm [thread:$0]  (%p753_p5), %s553_s25, 256, %s1254_s3, [#allocation5], %s1035_s15, %s1035_s15, %s1036_s8  }
 0x23c   : > { %995 = dma.done.wait (%p753_p5), [#allocation5], 256  }
 0x23d   : > { %997 = vsyncadd (%p753_p5), [#allocation5], 4294967040 }
 0x23e PF: > { %s18_s17 = sadd.s32 1, %s1020_s17   ;;  %s1261_s12 = smov %s1004_s13 }
 0x23f   : > { %p15_p7 = scmp.ge.s32.totalorder %s18_s17, 5   ;;  %s1262_s13 = smov %s1008_s14 }
 0x240   : > { %s1263_s14 = smov %s1104_s24  ;;  %s1264_s15 = smov %s1016_s16 }
 0x241   : > { %s1265_s16 = smov %s1267_s18  ;;  %17 = sbr.rel (!%p15_p7) target bundleno = 6 (0x6), region = 95 }
 0x246   :  { %568 = vsyncpa [#allocation4], 1 }
 0x247   :  { %570 = vsyncpa [#allocation4 + $0x1], 1 }
 0x248   :  { %571 = vsyncpa [#allocation7], 1 }
 0x249   :  { %573 = vsyncpa [#allocation7 + $0x1], 1 }
 0x24a   :  { %574 = vsyncpa [#allocation5], 1 }
 0x24b   :  { %576 = vsyncpa [#allocation5 + $0x1], 1 }

</bundles_post_ra>
